<compile_context>
chip_gen: v7x
topology: tpu7x:2x2x1
jax: 0.10.0
libtpu: 0.0.40
codegen_flags: <defaults>
</compile_context>

<pallas_src>
import jax
import jax.numpy as jnp
from jax import lax
from jax.experimental import pallas as pl
from jax.experimental.pallas import tpu as pltpu


def _round_up(v, m):
    return ((v + m - 1) // m) * m


def _round_down_128(v):
    return max(128, (v // 128) * 128)


def _make_kernel(n_rows, tn, grid_n):
    # Static: does the last N tile read past the end of x?
    ragged = (grid_n * tn) != n_rows

    def kernel(batch_ref, inv_ref, x_ref, out_ref, acc_ref):
        # batch_ref: [1, TN] int32   (padded ids are -1 -> never match)
        # inv_ref:   [B_pad, 1] f32  (precomputed 1/max(count,1))
        # x_ref:     [TN, TF]        (x.dtype)
        # out_ref:   [B_pad, TF]     resident across the N (k) axis
        # acc_ref:   [B_pad, TF] f32 scratch
        k = pl.program_id(1)
        B = out_ref.shape[0]
        TN = x_ref.shape[0]

        @pl.when(k == 0)
        def _():
            acc_ref[...] = jnp.zeros_like(acc_ref)

        x_tile = x_ref[...]
        if ragged:
            # Last tile contains uninitialized VMEM past row N; zero it so
            # 0-weight * NaN/Inf garbage cannot poison the matmul.
            tail = n_rows - (grid_n - 1) * tn
            valid = jnp.where(k == grid_n - 1, tail, TN)
            rows = lax.broadcasted_iota(jnp.int32, (TN, 1), 0)
            x_tile = jnp.where(rows < valid, x_tile, 0).astype(x_ref.dtype)

        # Segment-sum as an MXU mask-matmul in x.dtype, exact f32 accumulation.
        batch_ids = batch_ref[...]                                # [1, TN]
        row_ids = lax.broadcasted_iota(jnp.int32, (B, TN), 0)     # [B, TN]
        mask = (row_ids == batch_ids).astype(x_tile.dtype)        # [B, TN]
        acc_ref[...] += jnp.dot(mask, x_tile,
                                preferred_element_type=jnp.float32)

        @pl.when(k == pl.num_programs(1) - 1)
        def _():
            out_ref[...] = (acc_ref[...] * inv_ref[...]).astype(out_ref.dtype)

    return kernel


def global_mean_pool(x, batch, num_graphs, *, tn=1024, tf=1024):
    """x: [N, F] float, batch: [N] int ids in [0, B), num_graphs: static int B.

    Returns [B, F]. Nodes with batch id outside [0, B) are dropped (fixed-size
    scatter-mean semantics; PyG would instead infer B = max(batch)+1).
    """
    N, F = x.shape
    B = int(num_graphs)
    xbytes = x.dtype.itemsize

    B_pad = _round_up(max(B, 1), 8)          # sublane-aligned output rows

    # ---- F tiling: never copy x unless F is both unaligned and very wide ----
    if F % 128 == 0:
        F_eff, x_in = F, x
        TF = _round_down_128(min(int(tf), F_eff))
        if F_eff >= 256:
            # >= 2 'parallel' F tiles so both v7x TensorCores get work.
            TF = min(TF, _round_up(F_eff // 2, 128))
    elif F <= 2048:
        # Unaligned but modest F: one full-width tile (block == full dim),
        # no padded copy of x (stores to out are masked vst, negligible).
        F_eff, x_in, TF = F, x, F
    else:
        # Rare fallback: very wide, unaligned F -> pad (one copy of x).
        F_eff = _round_up(F, 128)
        x_in = jnp.pad(x, ((0, 0), (0, F_eff - F)))
        TF = _round_down_128(min(int(tf), F_eff))
        TF = min(TF, _round_up(F_eff // 2, 128))
    grid_f = pl.cdiv(F_eff, TF)

    # ---- N tiling: big tiles, capped by vreg pressure and VMEM budget -------
    # vreg pressure: iota/hit/mask live set is B_pad*TN elements.
    tn_cap = min(int(tn), max(128, ((32768 // B_pad) // 128) * 128))
    # VMEM: keep the double-buffered x tile under ~24 MiB.
    while 2 * tn_cap * TF * xbytes > 24 * 1024 * 1024 and tn_cap > 128:
        tn_cap = _round_down_128(tn_cap // 2)

    batch_i32 = batch.astype(jnp.int32)
    if N <= tn_cap:
        TN, grid_n = N, 1
        batch_in = batch_i32.reshape(1, N)
    else:
        TN = tn_cap
        grid_n = pl.cdiv(N, TN)
        # Pad only the tiny id vector (N*4 bytes); x is streamed unpadded and
        # its ragged last tile is masked in-kernel.
        batch_in = (jnp.full((1, grid_n * TN), -1, dtype=jnp.int32)
                    .at[0, :N].set(batch_i32))

    # ---- per-graph inverse counts, computed once in the wrapper -------------
    # (f32 counts are exact for graphs with < ~2^24 nodes)
    cnt = jnp.zeros((B_pad,), jnp.float32).at[batch_i32].add(1.0, mode="drop")
    inv = (1.0 / jnp.maximum(cnt, 1.0)).reshape(B_pad, 1)

    # ---- VMEM limit derived from actual tile sizes (safe on v7x 64 MiB/TC) --
    est = (2 * TN * TF * xbytes          # double-buffered x tile
           + 2 * TN * 4                  # batch-id tile
           + 4 * B_pad * 4               # inverse counts
           + B_pad * TF * 4              # f32 accumulator scratch
           + 2 * B_pad * TF * xbytes     # output block
           + B_pad * TN * (5 + xbytes))  # iota / hit / mask working set
    vmem_limit = int(min(max(2 * est, 32 * 1024 * 1024), 64 * 1024 * 1024))

    kernel = _make_kernel(N, TN, grid_n)

    out = pl.pallas_call(
        kernel,
        out_shape=jax.ShapeDtypeStruct((B_pad, F_eff), x.dtype),
        grid_spec=pltpu.PrefetchScalarGridSpec(
            num_scalar_prefetch=0,
            grid=(grid_f, grid_n),                               # F parallel, N reduction last
            in_specs=[
                pl.BlockSpec((1, TN), lambda j, k: (0, k)),      # batch ids
                pl.BlockSpec((B_pad, 1), lambda j, k: (0, 0)),   # 1/counts
                pl.BlockSpec((TN, TF), lambda j, k: (k, j)),     # x tile
            ],
            out_specs=pl.BlockSpec((B_pad, TF), lambda j, k: (0, j)),
            scratch_shapes=[pltpu.VMEM((B_pad, TF), jnp.float32)],
        ),
        compiler_params=pltpu.CompilerParams(
            dimension_semantics=("parallel", "arbitrary"),
            vmem_limit_bytes=vmem_limit,
        ),
    )(batch_in, inv, x_in)

    return out[:B, :F]


def _ref_global_mean_pool(x, batch, B):
    one_hot = (jnp.arange(B)[:, None] == batch[None, :]).astype(jnp.float32)
    sums = one_hot @ x.astype(jnp.float32)
    cnts = jnp.maximum(one_hot.sum(-1, keepdims=True), 1.0)
    return (sums / cnts).astype(x.dtype)


if __name__ == "__main__":
    key = jax.random.PRNGKey(0)
    k1, k2, k3 = jax.random.split(key, 3)

    # Test 1: small graph batch (8 nodes, 32 features, 2 graphs); single tile.
    N, F, B = 8, 32, 2
    x = jax.random.normal(k1, (N, F), dtype=jnp.float32)
    batch = jnp.array([0, 0, 0, 0, 0, 1, 1, 1], dtype=jnp.int32)
    out = jax.block_until_ready(global_mean_pool(x, batch, B))
    ref = _ref_global_mean_pool(x, batch, B)
    assert out.shape == (B, F)
    assert jnp.allclose(out, ref, atol=1e-5, rtol=1e-5)

    # Test 2: ragged multi-tile N (no padded x copy, in-kernel tail masking),
    # unaligned F handled as a single full-width tile, one empty graph (id 4).
    N2, F2, B2 = 300, 160, 6
    x2 = jax.random.normal(k2, (N2, F2), dtype=jnp.float32)
    sizes = jnp.array([40, 90, 10, 100, 0, 60])  # sums to 300, graph 4 empty
    batch2 = jnp.repeat(jnp.arange(B2), sizes, total_repeat_length=N2).astype(jnp.int32)
    out2 = jax.block_until_ready(global_mean_pool(x2, batch2, B2, tn=128))
    ref2 = _ref_global_mean_pool(x2, batch2, B2)
    assert out2.shape == (B2, F2)
    assert jnp.allclose(out2, ref2, atol=1e-5, rtol=1e-5)

    # Test 3: 128-aligned F -> exercises the tiled-F ('parallel') path plus
    # the ragged-N accumulator path.
    N3, F3, B3 = 300, 256, 6
    x3 = jax.random.normal(k3, (N3, F3), dtype=jnp.float32)
    out3 = jax.block_until_ready(global_mean_pool(x3, batch2, B3, tn=128))
    ref3 = _ref_global_mean_pool(x3, batch2, B3)
    assert out3.shape == (B3, F3)
    assert jnp.allclose(out3, ref3, atol=1e-5, rtol=1e-5)

    print("KERNEL_OK")
</pallas_src>

<mosaic_0001>
module attributes {stable_mosaic.version = 11 : i64} {
  func.func @kernel(%arg0: i32, %arg1: i32, %arg2: memref<1x8xi32, #tpu.memory_space<vmem>>, %arg3: memref<8x1xf32, #tpu.memory_space<vmem>>, %arg4: memref<8x32xf32, #tpu.memory_space<vmem>>, %arg5: memref<8x32xf32, #tpu.memory_space<vmem>>, %arg6: memref<8x32xf32, #tpu.memory_space<vmem>>) attributes {dimension_semantics = [#tpu.dimension_semantics<parallel>, #tpu.dimension_semantics<arbitrary>], iteration_bounds = array<i64: 1, 1>, scalar_prefetch = 0 : i64, scratch_operands = 1 : i64, tpu.core_type = #tpu.core_type<tc>, window_params = [{transform_indices = @transform_0, window_bounds = array<i64: 1, 8>}, {pipeline_mode = #tpu.pipeline_mode<synchronous>, transform_indices = @transform_1, window_bounds = array<i64: 8, 1>}, {transform_indices = @transform_2, window_bounds = array<i64: 8, 32>}, {transform_indices = @transform_3, window_bounds = array<i64: 8, 32>}]} {
    %c0_i32 = arith.constant 0 : i32
    %0 = arith.cmpi eq, %arg1, %c0_i32 : i32
    %1 = arith.extui %0 : i1 to i32
    %c0_i32_0 = arith.constant 0 : i32
    %2 = arith.cmpi ne, %1, %c0_i32_0 : i32
    scf.if %2 {
      %cst_10 = arith.constant 0.000000e+00 : f32
      %17 = vector.broadcast %cst_10 : f32 to vector<8x32xf32>
      %c0_11 = arith.constant 0 : index
      %c0_12 = arith.constant 0 : index
      %18 = vector.load %arg6[%c0_11, %c0_12] : memref<8x32xf32, #tpu.memory_space<vmem>>, vector<8x32xf32>
      tpu.vector_store %arg6[%c0_11, %c0_12], %17 {strides = array<i32>} : memref<8x32xf32, #tpu.memory_space<vmem>>, vector<8x32xf32>,
    } else {
    }
    %c0 = arith.constant 0 : index
    %c0_1 = arith.constant 0 : index
    %3 = vector.load %arg4[%c0, %c0_1] : memref<8x32xf32, #tpu.memory_space<vmem>>, vector<8x32xf32>
    %c0_2 = arith.constant 0 : index
    %c0_3 = arith.constant 0 : index
    %4 = vector.load %arg2[%c0_2, %c0_3] : memref<1x8xi32, #tpu.memory_space<vmem>>, vector<1x8xi32>
    %5 = tpu.iota {dimensions = array<i32: 0>} : vector<8x8xi32>
    %6 = vector.broadcast %4 : vector<1x8xi32> to vector<8x8xi32>
    %7 = arith.cmpi eq, %5, %6 : vector<8x8xi32>
    %8 = arith.extui %7 : vector<8x8xi1> to vector<8x8xi32>
    %9 = arith.sitofp %8 : vector<8x8xi32> to vector<8x8xf32>
    %c0_4 = arith.constant 0 : index
    %c0_5 = arith.constant 0 : index
    %10 = vector.load %arg6[%c0_4, %c0_5] : memref<8x32xf32, #tpu.memory_space<vmem>>, vector<8x32xf32>
    %cst = arith.constant dense<0.000000e+00> : vector<8x32xf32>
    %11 = tpu.matmul %9, %3, %cst {dimension_numbers = #tpu.dot_dimension_numbers<[1], [0], [0], [1], [0, 0, 1, 1], [], []>} : vector<8x8xf32>, vector<8x32xf32>, vector<8x32xf32> -> vector<8x32xf32>
    %12 = arith.addf %10, %11 : vector<8x32xf32>
    %c0_6 = arith.constant 0 : index
    %c0_7 = arith.constant 0 : index
    %13 = vector.load %arg6[%c0_6, %c0_7] : memref<8x32xf32, #tpu.memory_space<vmem>>, vector<8x32xf32>
    tpu.vector_store %arg6[%c0_6, %c0_7], %12 {strides = array<i32>} : memref<8x32xf32, #tpu.memory_space<vmem>>, vector<8x32xf32>,
    %c0_i32_8 = arith.constant 0 : i32
    %14 = arith.cmpi eq, %arg1, %c0_i32_8 : i32
    %15 = arith.extui %14 : i1 to i32
    %c0_i32_9 = arith.constant 0 : i32
    %16 = arith.cmpi ne, %15, %c0_i32_9 : i32
    scf.if %16 {
      %c0_10 = arith.constant 0 : index
      %c0_11 = arith.constant 0 : index
      %17 = vector.load %arg6[%c0_10, %c0_11] : memref<8x32xf32, #tpu.memory_space<vmem>>, vector<8x32xf32>
      %c0_12 = arith.constant 0 : index
      %c0_13 = arith.constant 0 : index
      %18 = vector.load %arg3[%c0_12, %c0_13] : memref<8x1xf32, #tpu.memory_space<vmem>>, vector<8x1xf32>
      %19 = vector.broadcast %18 : vector<8x1xf32> to vector<8x32xf32>
      %20 = arith.mulf %17, %19 : vector<8x32xf32>
      %c0_14 = arith.constant 0 : index
      %c0_15 = arith.constant 0 : index
      %21 = vector.load %arg5[%c0_14, %c0_15] : memref<8x32xf32, #tpu.memory_space<vmem>>, vector<8x32xf32>
      tpu.vector_store %arg5[%c0_14, %c0_15], %20 {strides = array<i32>} : memref<8x32xf32, #tpu.memory_space<vmem>>, vector<8x32xf32>,
    } else {
    }
    return
  }
  func.func @transform_0(%arg0: i32, %arg1: i32) -> (i32, i32) {
    %c0_i32 = arith.constant 0 : i32
    %c0_i32_0 = arith.constant 0 : i32
    return %c0_i32, %arg1 : i32, i32
  }
  func.func @transform_1(%arg0: i32, %arg1: i32) -> (i32, i32) {
    %c0_i32 = arith.constant 0 : i32
    %c0_i32_0 = arith.constant 0 : i32
    %c0_i32_1 = arith.constant 0 : i32
    return %c0_i32, %c0_i32_0 : i32, i32
  }
  func.func @transform_2(%arg0: i32, %arg1: i32) -> (i32, i32) {
    %c0_i32 = arith.constant 0 : i32
    return %arg1, %arg0 : i32, i32
  }
  func.func @transform_3(%arg0: i32, %arg1: i32) -> (i32, i32) {
    %c0_i32 = arith.constant 0 : i32
    %c0_i32_0 = arith.constant 0 : i32
    return %c0_i32, %arg0 : i32, i32
  }
}

</mosaic_0001>

<bundles_post_ra>
// kernel: tpu_custom_call.1
= control target key start
LH: loop header
LB: loop body
LE: loop exit
PB: predicated region body
PF: predicated region fallthrough
CT: control target
= control target key end

     0   :  { %v23_v2 = vlaneseq  ;;  %v175_v3 = vmov 0.0   ;;  %vm176_vm0 = vmmov 0   ;;  %vm19_vm1 = vcmask 261120   ;;  %s223_s0 = inlined_call_operand.vmem [shape: s32[1,8], index: 0, kind: input, shape index: {}]   ;;  %s224_s1 = inlined_call_operand.vmem [shape: f32[8,1], index: 1, kind: input, shape index: {}]   ;;  %s225_s2 = inlined_call_operand.vmem [shape: f32[8,32], index: 2, kind: input, shape index: {}]   ;;  %s226_s3 = inlined_call_operand.hbm [shape: f32[8,32], index: 3, kind: output, shape index: {}]  }
   0x1   :  { %v21_v0 = vld [vmem:[%s225_s2] sm:$0xff]  ;;  %141 = vmatprep.subr.mxu0 %v175_v3  ;;  %143 = vmatprep.mubr.msk.f32.mxu0 %vm176_vm0, %v175_v3 }
   0x2   :  { %v136_v1 = vld [vmem:[%s223_s0] ss:$0 sm:$0xff] }
   0x3   :  { %v114_v4 = vld [vmem:[%s224_s1] sm:$0xff] }
   0x4   :  { %8 = vsyncpa [#allocation4], 0  ;;  %142 = vmatpush3.msra.mxu0 %v21_v0  ;;  %v24_v5 = vshrl.u32 %v23_v2, 7  ;;  %v177_v6 = vmov 0   ;;  %20 = vst.msk [vmem:[#allocation2] sm:$0xff] %vm19_vm1, %v175_v3  ;;  %vm33_vm2 = vcmask 64512  }
   0x5   :  { %150 = vset.pattern.permute.xlu0 %v177_v6  ;;  %s178_s0 = smov [#allocation3]  }
   0x6   :  { %117 = vperm.xlu0 %150, %v114_v4   ;;  %vm29_vm3 = vcmp.eq.s32.totalorder %v24_v5, %v136_v1  ;;  %s128_s1 = sshll.u32 %s178_s0, 4  ;;  %s129_s1 = int_to_ptr.vmem [resolvable:$true] %s128_s1 }
   0x7   :  { %v137_v7 = vsel %vm29_vm3, 1.0, %v175_v3  ;;  %s151_s2 = scalar_lea.vmem %s129_s1, 128  ;;  %p156_p1 = scmp.lt.s32.totalorder %s129_s1, %s129_s1 }
   0x8   :  { %144 = vmatmul.mubr.msk.f32.vlgmr.msra.gmra.mrb[0].mxu0 %vm33_vm2, %v137_v7  ;;  %p152_p0 = scmp.ne.s32.totalorder %s129_s1, %s151_s2  ;;  %p157_p2 = scmp.lt.s32.totalorder %s151_s2, %s151_s2 }
   0xa   :  { %p158_p3 = por %p157_p2, %p156_p1 }
   0xb   :  { %v32_v8 = vld [vmem:[#allocation2] sm:$0xff] }
   0xc   :  { %p159_p4 = pnand %p158_p3, %p152_p0 }
  0x85   :  { %v118_v12 = vpop.permute.xlu0 %117 }
  0xdb   :  { %v103_v9 = vpop.f32.mrb[0].mxu0 }
  0xdc   :  { %v107_v10 = vadd.f32 %v103_v9, %v32_v8  ;;  %v145_v11 = vpop.f32.mrb[1].mxu0 }
  0xde   :  { %109 = vst.msk [vmem:[#allocation2] sm:$0xff] %vm19_vm1, %v107_v10 }
  0xe5   :  { %v113_v13 = vld [vmem:[#allocation2] sm:$0xff] }
  0xe6   :  { %v120_v14 = vmul.f32 %v118_v12, %v113_v13 }
  0xe8   :  { %121 = vst.msk [vmem:[#allocation3] sm:$0xff] %vm19_vm1, %v120_v14 }
  0xe9   :  { %162 = shalt.err (!%p159_p4)
}
  0xea   :  { %s163_s20 = scalar_lea.hbm %s226_s3, 128 }
  0xeb   :  { %p164_p5 = scmp.ne.s32.totalorder %s226_s3, %s163_s20  ;;  %p167_p6 = scmp.lt.u32.totalorder %s163_s20, %s226_s3 }
  0xed   :  { %p169_p7 = pnand %p167_p6, %p164_p5 }
  0xef   :  { %172 = shalt.err (!%p169_p7)
}
  0xf0   :  { %131 = dma.vmem_to_hbm [thread:$0]  %s129_s1, 128, %s226_s3, [#allocation4]  }
  0xf1   :  { %173 = dma.done.wait [#allocation4], 128  }
  0xf2   :  { %174 = vsyncadd [#allocation4], 4294967168 }
  0xf3   :  { %135 = vsyncpa [#allocation4], 1 }

</bundles_post_ra>
